<compile_context>
chip_gen: v7x
topology: tpu7x:2x2x1
jax: 0.10.0
libtpu: 0.0.40
codegen_flags: <defaults>
</compile_context>

<pallas_src>
import functools

import jax
import jax.numpy as jnp
from jax.experimental import pallas as pl
from jax.experimental.pallas import tpu as pltpu

LANE_PAD = 128  # lane-dense packed width for params / output


def my_atten_prepare(Wa, ba, Wl, bl, V, query_size, key_size):
    """One-time parameter packing (run once per sequence, NOT per decoder step).

    Folds the encoder outputs V into the parameters:  (aw @ V) @ Wl_v is
    rewritten as aw @ (V @ Wl_v), so V never enters the kernel.

    Returns P of shape (Dq+Dk + 8 + 128, 128):
      rows [0      : Dqk  ]  cols[:V1]      = Wa.T          (attention linear)
                             cols[V1:V1+O]  = Wl.T[:Dq]     (Q half of out linear; K rows = 0)
      row  [Dqk]             cols[:V1]=ba,  cols[V1:V1+O]=bl   (bias row; 7 zero pad rows)
      rows [Dqk+8 : +128 ]   cols[:V1]      = I_{V1}        (passes atten weights through)
                             cols[V1:V1+O]  = V @ Wl.T[Dq:] (fused value*out-linear)
    """
    Dq, Dk = query_size, key_size
    Dqk = Dq + Dk
    V1 = Wa.shape[0]
    O = Wl.shape[0]
    assert V1 + O <= LANE_PAD

    V0 = (V[0] if V.ndim == 3 else V).astype(jnp.float32)   # (V1, V2)
    Wa_t = Wa.T.astype(jnp.float32)                         # (Dqk, V1)
    Wl_t = Wl.T.astype(jnp.float32)                         # (Dq+V2, O)
    Wl_q = Wl_t[:Dq]                                        # (Dq, O)
    Wl_v = Wl_t[Dq:]                                        # (V2, O)
    VW = V0 @ Wl_v                                          # (V1, O)

    P = jnp.zeros((Dqk + 8 + LANE_PAD, LANE_PAD), jnp.float32)
    P = P.at[:Dqk, :V1].set(Wa_t)
    P = P.at[:Dq, V1:V1 + O].set(Wl_q)
    P = P.at[Dqk, :V1].set(ba.astype(jnp.float32))
    P = P.at[Dqk, V1:V1 + O].set(bl.astype(jnp.float32))
    P = P.at[Dqk + 8:Dqk + 8 + V1, :V1].set(jnp.eye(V1, dtype=jnp.float32))
    P = P.at[Dqk + 8:Dqk + 8 + V1, V1:V1 + O].set(VW)
    return P


def _my_atten_kernel(qk_ref, p_ref, out_ref, *, Dqk, V1):
    # qk_ref: (M, Dqk)   p_ref: (Dqk+8+128, 128)   out_ref: (M, 128)
    qk = qk_ref[...]                         # (M, Dqk)
    w1 = p_ref[0:Dqk, :]                     # (Dqk, 128)  [Wa.T | Wl_q | 0]
    b1 = p_ref[Dqk:Dqk + 1, :]               # (1,   128)  [ba   | bl   | 0]
    vw2 = p_ref[Dqk + 8:, :]                 # (128, 128)  [I    | V@Wl_v | 0]

    # Stage 1: one fused dot produces attention logits (cols < V1) and the Q
    # half of the output linear (cols V1:V1+O) in a single (M,128) register slab.
    pre = jnp.dot(qk, w1, preferred_element_type=jnp.float32) + b1    # (M, 128)

    # Softmax over cols < V1, done full-width with a lane mask (no lane slices).
    col = jax.lax.broadcasted_iota(jnp.int32, pre.shape, 1)
    valid = col < V1
    logits = jnp.where(valid, pre, -jnp.inf)
    m = jnp.max(logits, axis=-1, keepdims=True)
    e = jnp.where(valid, jnp.exp(pre - m), 0.0)                       # zeros beyond V1
    aw = e * pl.reciprocal(jnp.sum(e, axis=-1, keepdims=True))        # (M, 128)

    # Stage 2: one full-width dot yields [ atten_weight | result | 0 ]:
    #   cols < V1      : 0        + aw @ I        = aw
    #   cols V1:V1+O   : q@Wl_q+bl + aw @ (V@Wl_v) = result
    out = jnp.where(valid, 0.0, pre) + jnp.dot(aw, vw2,
                                               preferred_element_type=jnp.float32)
    out_ref[...] = out.astype(out_ref.dtype)                          # one unmasked store


@functools.partial(jax.jit, static_argnames=("V1", "O"))
def my_atten_steps(Qs, Ks, P, *, V1, O):
    """Hot path: T decoder steps fused into ONE un-gridded pallas_call.

    Qs: (T, B, Dq)  Ks: (T, B, Dk)  P: packed params from my_atten_prepare().
    Returns (results (T, B, O), atten_weights (T, B, V1)).
    """
    T, B, Dq = Qs.shape
    Dk = Ks.shape[2]
    Dqk = Dq + Dk
    M = T * B
    rows, Wpad = P.shape

    # Single lane-contiguous input slab: [Q | K] for all steps.
    QK = jnp.concatenate([Qs, Ks], axis=-1).reshape(M, Dqk)

    kernel = functools.partial(_my_atten_kernel, Dqk=Dqk, V1=V1)

    cost = pl.CostEstimate(
        flops=2 * M * (Dqk * Wpad + Wpad * Wpad),
        transcendentals=M * Wpad,
        bytes_accessed=4 * (QK.size + P.size + M * Wpad),
    )

    packed = pl.pallas_call(
        kernel,
        grid=(1,),
        in_specs=[
            pl.BlockSpec((M, Dqk), lambda i: (0, 0)),
            pl.BlockSpec((rows, Wpad), lambda i: (0, 0)),
        ],
        out_specs=pl.BlockSpec((M, Wpad), lambda i: (0, 0)),
        out_shape=jax.ShapeDtypeStruct((M, Wpad), jnp.float32),
        compiler_params=pltpu.CompilerParams(dimension_semantics=("arbitrary",)),
        cost_estimate=cost,
    )(QK, P)

    atten_weights = packed[:, :V1].reshape(T, B, V1)
    results = packed[:, V1:V1 + O].reshape(T, B, O)
    return results, atten_weights


def my_atten_pallas(Q, K, P, *, value_size1, output_size):
    """Module-shaped single-step call.

    Q: (1, B, Dq)  K: (1, B, Dk); P from my_atten_prepare() (prepared once per
    sequence — it already folds in V).  Returns (result (1, B, O),
    atten_weight (B, V1)) exactly like the PyTorch module.
    """
    result, aw = my_atten_steps(Q, K, P, V1=value_size1, O=output_size)
    return result, aw[0]


def my_atten_ref(Q, K, V, Wa, ba, Wl, bl):
    """Pure-JAX reference matching the PyTorch module exactly."""
    qk = jnp.concatenate([Q[0], K[0]], axis=-1)
    logits = qk @ Wa.T + ba
    aw = jax.nn.softmax(logits, axis=-1)
    temp = jnp.einsum("bk,kd->bd", aw, V[0])
    out = jnp.concatenate([Q[0], temp], axis=-1) @ Wl.T + bl
    return out[None], aw


if __name__ == "__main__":
    # Module hyper-parameters (small, tutorial-like sizes)
    query_size, key_size = 32, 32
    value_size1, value_size2 = 32, 64
    output_size = 32
    B = 8   # Q.shape[1]
    T = 4   # decoder steps fused into a single launch

    key = jax.random.PRNGKey(0)
    ks = jax.random.split(key, 7)

    Qs = jax.random.normal(ks[0], (T, B, query_size), dtype=jnp.float32)
    Ks = jax.random.normal(ks[1], (T, B, key_size), dtype=jnp.float32)
    V = jax.random.normal(ks[2], (1, value_size1, value_size2), dtype=jnp.float32)

    # PyTorch Linear default init: U(-1/sqrt(in), 1/sqrt(in))
    fan_a = query_size + key_size
    fan_l = query_size + value_size2
    Wa = jax.random.uniform(ks[3], (value_size1, fan_a), jnp.float32,
                            -1.0 / fan_a ** 0.5, 1.0 / fan_a ** 0.5)
    ba = jax.random.uniform(ks[4], (value_size1,), jnp.float32,
                            -1.0 / fan_a ** 0.5, 1.0 / fan_a ** 0.5)
    Wl = jax.random.uniform(ks[5], (output_size, fan_l), jnp.float32,
                            -1.0 / fan_l ** 0.5, 1.0 / fan_l ** 0.5)
    bl = jax.random.uniform(ks[6], (output_size,), jnp.float32,
                            -1.0 / fan_l ** 0.5, 1.0 / fan_l ** 0.5)

    # One-time packing (per sequence: V = encoder outputs is folded in here).
    P = my_atten_prepare(Wa, ba, Wl, bl, V, query_size, key_size)
    jax.block_until_ready(P)

    # Batched hot path: T decoder steps in one launch.
    results, aws = my_atten_steps(Qs, Ks, P, V1=value_size1, O=output_size)
    jax.block_until_ready((results, aws))
    assert results.shape == (T, B, output_size)
    assert aws.shape == (T, B, value_size1)
    for t in range(T):
        ref_r, ref_a = my_atten_ref(Qs[t][None], Ks[t][None], V, Wa, ba, Wl, bl)
        assert jnp.allclose(results[t][None], ref_r, rtol=1e-5, atol=1e-5)
        assert jnp.allclose(aws[t], ref_a, rtol=1e-5, atol=1e-5)

    # Module-shaped single-step call (T == 1), matching the PyTorch signature.
    result, atten_weight = my_atten_pallas(Qs[:1], Ks[:1], P,
                                           value_size1=value_size1,
                                           output_size=output_size)
    jax.block_until_ready((result, atten_weight))
    ref_result, ref_aw = my_atten_ref(Qs[:1], Ks[:1], V, Wa, ba, Wl, bl)
    assert result.shape == (1, B, output_size)
    assert atten_weight.shape == (B, value_size1)
    assert jnp.allclose(result, ref_result, rtol=1e-5, atol=1e-5)
    assert jnp.allclose(atten_weight, ref_aw, rtol=1e-5, atol=1e-5)

    print("KERNEL_OK")
</pallas_src>

<mosaic_0001>
module attributes {stable_mosaic.version = 11 : i64} {
  func.func @_my_atten_kernel(%arg0: i32, %arg1: memref<32x64xf32, #tpu.memory_space<vmem>>, %arg2: memref<200x128xf32, #tpu.memory_space<vmem>>, %arg3: memref<32x128xf32, #tpu.memory_space<vmem>>) attributes {dimension_semantics = [#tpu.dimension_semantics<arbitrary>], iteration_bounds = array<i64: 1>, scalar_prefetch = 0 : i64, scratch_operands = 0 : i64, tpu.core_type = #tpu.core_type<tc>, window_params = [{pipeline_mode = #tpu.pipeline_mode<synchronous>, transform_indices = @transform_0, window_bounds = array<i64: 32, 64>}, {pipeline_mode = #tpu.pipeline_mode<synchronous>, transform_indices = @transform_1, window_bounds = array<i64: 200, 128>}, {pipeline_mode = #tpu.pipeline_mode<synchronous>, transform_indices = @transform_2, window_bounds = array<i64: 32, 128>}]} {
    %c0 = arith.constant 0 : index
    %c0_0 = arith.constant 0 : index
    %0 = vector.load %arg1[%c0, %c0_0] : memref<32x64xf32, #tpu.memory_space<vmem>>, vector<32x64xf32>
    %c0_1 = arith.constant 0 : index
    %c0_2 = arith.constant 0 : index
    %1 = vector.load %arg2[%c0_1, %c0_2] : memref<200x128xf32, #tpu.memory_space<vmem>>, vector<64x128xf32>
    %c64 = arith.constant 64 : index
    %c0_3 = arith.constant 0 : index
    %2 = vector.load %arg2[%c64, %c0_3] : memref<200x128xf32, #tpu.memory_space<vmem>>, vector<1x128xf32>
    %c72 = arith.constant 72 : index
    %c0_4 = arith.constant 0 : index
    %3 = vector.load %arg2[%c72, %c0_4] : memref<200x128xf32, #tpu.memory_space<vmem>>, vector<128x128xf32>
    %cst = arith.constant dense<0.000000e+00> : vector<32x128xf32>
    %4 = tpu.matmul %0, %1, %cst {dimension_numbers = #tpu.dot_dimension_numbers<[1], [0], [0], [1], [0, 0, 1, 1], [], []>} : vector<32x64xf32>, vector<64x128xf32>, vector<32x128xf32> -> vector<32x128xf32>
    %5 = vector.broadcast %2 : vector<1x128xf32> to vector<32x128xf32>
    %6 = arith.addf %4, %5 : vector<32x128xf32>
    %7 = tpu.iota {dimensions = array<i32: 1>} : vector<32x128xi32>
    %c32_i32 = arith.constant 32 : i32
    %8 = vector.broadcast %c32_i32 : i32 to vector<32x128xi32>
    %9 = arith.cmpi slt, %7, %8 : vector<32x128xi32>
    %cst_5 = arith.constant 0xFF800000 : f32
    %10 = vector.broadcast %cst_5 : f32 to vector<32x128xf32>
    %11 = arith.select %9, %6, %10 : vector<32x128xi1>, vector<32x128xf32>
    %cst_6 = arith.constant dense<0xFF800000> : vector<32xf32>
    %12 = vector.multi_reduction <maximumf>, %11, %cst_6 [1] : vector<32x128xf32> to vector<32xf32>
    %13 = vector.shape_cast %12 : vector<32xf32> to vector<32x1xf32>
    %14 = vector.broadcast %13 : vector<32x1xf32> to vector<32x128xf32>
    %15 = arith.subf %6, %14 : vector<32x128xf32>
    %16 = math.exp %15 : vector<32x128xf32>
    %cst_7 = arith.constant 0.000000e+00 : f32
    %17 = vector.broadcast %cst_7 : f32 to vector<32x128xf32>
    %18 = arith.select %9, %16, %17 : vector<32x128xi1>, vector<32x128xf32>
    %cst_8 = arith.constant dense<0.000000e+00> : vector<32xf32>
    %19 = vector.multi_reduction <add>, %18, %cst_8 [1] : vector<32x128xf32> to vector<32xf32>
    %20 = vector.shape_cast %19 : vector<32xf32> to vector<32x1xf32>
    %21 = tpu.reciprocal %20 : vector<32x1xf32> -> vector<32x1xf32>
    %22 = vector.broadcast %21 : vector<32x1xf32> to vector<32x128xf32>
    %23 = arith.mulf %18, %22 : vector<32x128xf32>
    %cst_9 = arith.constant 0.000000e+00 : f32
    %24 = vector.broadcast %cst_9 : f32 to vector<32x128xf32>
    %25 = arith.select %9, %24, %6 : vector<32x128xi1>, vector<32x128xf32>
    %cst_10 = arith.constant dense<0.000000e+00> : vector<32x128xf32>
    %26 = tpu.matmul %23, %3, %cst_10 {dimension_numbers = #tpu.dot_dimension_numbers<[1], [0], [0], [1], [0, 0, 1, 1], [], []>} : vector<32x128xf32>, vector<128x128xf32>, vector<32x128xf32> -> vector<32x128xf32>
    %27 = arith.addf %25, %26 : vector<32x128xf32>
    %c0_11 = arith.constant 0 : index
    %c0_12 = arith.constant 0 : index
    %28 = vector.load %arg3[%c0_11, %c0_12] : memref<32x128xf32, #tpu.memory_space<vmem>>, vector<32x128xf32>
    tpu.vector_store %arg3[%c0_11, %c0_12], %27 {strides = array<i32>} : memref<32x128xf32, #tpu.memory_space<vmem>>, vector<32x128xf32>,
    return
  }
  func.func @transform_0(%arg0: i32) -> (i32, i32) {
    %c0_i32 = arith.constant 0 : i32
    %c0_i32_0 = arith.constant 0 : i32
    %c0_i32_1 = arith.constant 0 : i32
    return %c0_i32, %c0_i32_0 : i32, i32
  }
  func.func @transform_1(%arg0: i32) -> (i32, i32) {
    %c0_i32 = arith.constant 0 : i32
    %c0_i32_0 = arith.constant 0 : i32
    %c0_i32_1 = arith.constant 0 : i32
    return %c0_i32, %c0_i32_0 : i32, i32
  }
  func.func @transform_2(%arg0: i32) -> (i32, i32) {
    %c0_i32 = arith.constant 0 : i32
    %c0_i32_0 = arith.constant 0 : i32
    %c0_i32_1 = arith.constant 0 : i32
    return %c0_i32, %c0_i32_0 : i32, i32
  }
}

</mosaic_0001>

<bundles_post_ra>
// kernel: my_atten_steps.1
= control target key start
LH: loop header
LB: loop body
LE: loop exit
PB: predicated region body
PF: predicated region fallthrough
CT: control target
= control target key end

     0   :  { %7 = vsyncpa [#allocation3], 0  ;;  %s493_s9 = smov [#allocation2]   ;;  %s598_s0 = inlined_call_operand.vmem [shape: f32[32,64], index: 0, kind: input, shape index: {}]   ;;  %s599_s1 = inlined_call_operand.hbm [shape: f32[200,128], index: 1, kind: input, shape index: {}]   ;;  %s600_s2 = inlined_call_operand.vmem [shape: f32[32,128], index: 2, kind: output, shape index: {}]  }
   0x1   :  { %s15_s10 = sshll.u32 %s493_s9, 4  ;;  %s469_s13 = scalar_lea.hbm %s599_s1, 3200  ;;  %s16_s10 = int_to_ptr.vmem [resolvable:$true] %s15_s10 }
   0x2   :  { %p470_p0 = scmp.ne.s32.totalorder %s599_s1, %s469_s13  ;;  %p473_p1 = scmp.lt.u32.totalorder %s469_s13, %s599_s1 }
   0x4   :  { %p475_p2 = pnand %p473_p1, %p470_p0 }
   0x6   :  { %478 = shalt.err (!%p475_p2)
}
   0x7   :  { %s479_s18 = scalar_lea.vmem %s16_s10, 3200  ;;  %p484_p4 = scmp.lt.s32.totalorder %s16_s10, %s16_s10 }
   0x8   :  { %p480_p3 = scmp.ne.s32.totalorder %s16_s10, %s479_s18  ;;  %p485_p5 = scmp.lt.s32.totalorder %s479_s18, %s479_s18 }
   0xa   :  { %p486_p6 = por %p485_p5, %p484_p4 }
   0xc   :  { %p487_p7 = pnand %p486_p6, %p480_p3 }
   0xe   :  { %490 = shalt.err (!%p487_p7)
}
   0xf   :  { %s494_s19 = smov 128   ;;  %s495_s20 = smov 8  }
  0x10   :  { %21 = dma.hbm_to_vmem [thread:$0]  %s599_s1, 3200, %s16_s10, [#allocation3], %s494_s19, %s494_s19, %s495_s20  }
  0x11   :  { %491 = dma.done.wait [#allocation3], 3200  }
  0x12   :  { %492 = vsyncadd [#allocation3], 4294964096  ;;  %v29_v0 = vld [vmem:[#allocation2] sm:$0xff]  ;;  %v30_v1 = vld [vmem:[#allocation2 + $0x8] sm:$0xff]  ;;  %vm58_vm0 = vcmask 523264   ;;  %v156_v16 = vlaneseq }
  0x13   :  { %v31_v2 = vld [vmem:[#allocation2 + $0x10] sm:$0xff]  ;;  %v402_v3 = vpack.c.bf16 %v30_v1, %v29_v0  ;;  %v32_v4 = vld [vmem:[#allocation2 + $0x18] sm:$0xff]  ;;  %v33_v6 = vld [vmem:[#allocation2 + $0x20] sm:$0xff] }
  0x14   :  { %v406_v5 = vpack.c.bf16 %v32_v4, %v31_v2  ;;  %v34_v7 = vld [vmem:[#allocation2 + $0x28] sm:$0xff]  ;;  %v25_v8 = vld [vmem:[%s598_s0] sm:$0xff]  ;;  %v35_v10 = vld [vmem:[#allocation2 + $0x30] sm:$0xff]  ;;  %v539_v17 = vand.u32 127, %v156_v16 }
  0x15   :  { %403 = vmatprep.subr.bf16.mxu0 %v402_v3  ;;  %358 = vmatprep.mubr.msk.f32.mxu0 %vm58_vm0, %v25_v8  ;;  %v410_v9 = vpack.c.bf16 %v34_v7, %v33_v6  ;;  %v36_v11 = vld [vmem:[#allocation2 + $0x38] sm:$0xff]  ;;  %v26_v13 = vld [vmem:[%s598_s0 + $0x8] sm:$0xff]  ;;  %v27_v14 = vld [vmem:[%s598_s0 + $0x10] sm:$0xff] }
  0x16   :  { %405 = vmatpush3.bf16.msra.mxu0 %v402_v3  ;;  %v414_v12 = vpack.c.bf16 %v36_v11, %v35_v10  ;;  %v28_v15 = vld [vmem:[%s598_s0 + $0x18] sm:$0xff]  ;;  %v305_v18 = vld [vmem:[#allocation2 + $0x40] ss:$0 sm:$0xff]  ;;  %vm158_vm1 = vcmp.lt.s32.totalorder %v539_v17, 32  ;;  %v38_v31 = vld [vmem:[#allocation2 + $0x48] sm:$0xff] }
  0x17   :  { %407 = vmatprep.subr.bf16.mxu0 %v406_v5  ;;  %v39_v32 = vld [vmem:[#allocation2 + $0x50] sm:$0xff]  ;;  %v40_v33 = vld [vmem:[#allocation2 + $0x58] sm:$0xff]  ;;  %v41_v35 = vld [vmem:[#allocation2 + $0x60] sm:$0xff] }
  0x18   :  { %v418_v34 = vpack.c.bf16 %v39_v32, %v38_v31  ;;  %v422_v36 = vpack.c.bf16 %v41_v35, %v40_v33  ;;  %v42_v37 = vld [vmem:[#allocation2 + $0x68] sm:$0xff]  ;;  %v43_v38 = vld [vmem:[#allocation2 + $0x70] sm:$0xff]  ;;  %v44_v40 = vld [vmem:[#allocation2 + $0x78] sm:$0xff] }
  0x19   :  { %v426_v39 = vpack.c.bf16 %v43_v38, %v42_v37  ;;  %v45_v41 = vld [vmem:[#allocation2 + $0x80] sm:$0xff]  ;;  %v46_v63 = vld [vmem:[#allocation2 + $0x88] sm:$0xff]  ;;  %v47_v0 = vld [vmem:[#allocation2 + $0x90] sm:$0xff] }
  0x1a   :  { %409 = vmatpush3.bf16.msra.mxu0 %v406_v5  ;;  %419 = vmatprep.subr.bf16.mxu1 %v418_v34  ;;  %v430_v42 = vpack.c.bf16 %v45_v41, %v44_v40  ;;  %v434_v1 = vpack.c.bf16 %v47_v0, %v46_v63  ;;  %v48_v2 = vld [vmem:[#allocation2 + $0x98] sm:$0xff]  ;;  %v49_v3 = vld [vmem:[#allocation2 + $0xa0] sm:$0xff]  ;;  %v50_v5 = vld [vmem:[#allocation2 + $0xa8] sm:$0xff] }
  0x1b   :  { %411 = vmatprep.subr.bf16.mxu0 %v410_v9  ;;  %421 = vmatpush3.bf16.msra.mxu1 %v418_v34  ;;  %v438_v4 = vpack.c.bf16 %v49_v3, %v48_v2  ;;  %v51_v6 = vld [vmem:[#allocation2 + $0xb0] sm:$0xff]  ;;  %v52_v8 = vld [vmem:[#allocation2 + $0xb8] sm:$0xff] }
  0x1c   :  { %423 = vmatprep.subr.bf16.mxu1 %v422_v36  ;;  %v442_v7 = vpack.c.bf16 %v51_v6, %v50_v5 }
  0x1e   :  { %413 = vmatpush3.bf16.msra.mxu0 %v410_v9  ;;  %v53_v9 = vld [vmem:[#allocation2 + $0xc0] sm:$0xff] }
  0x1f   :  { %415 = vmatprep.subr.bf16.mxu0 %v414_v12  ;;  %425 = vmatpush3.bf16.msra.mxu1 %v422_v36  ;;  %v446_v10 = vpack.c.bf16 %v53_v9, %v52_v8 }
  0x20   :  { %427 = vmatprep.subr.bf16.mxu1 %v426_v39 }
  0x22   :  { %417 = vmatpush3.bf16.msra.mxu0 %v414_v12 }
  0x23   :  { %429 = vmatpush3.bf16.msra.mxu1 %v426_v39 }
  0x24   :  { %431 = vmatprep.subr.bf16.mxu1 %v430_v42 }
  0x25   :  { %359 = vmatmul.mubr.msk.f32.vlgmr.msra.gmra.mrb[0].mxu0 %vm58_vm0, %v26_v13 }
  0x26   :  { %361 = vmatprep.mubr.msk.f32.mxu0 %vm58_vm0, %v27_v14 }
  0x27   :  { %433 = vmatpush3.bf16.msra.mxu1 %v430_v42 }
  0x28   :  { %435 = vmatprep.subr.bf16.mxu1 %v434_v1 }
  0x29   :  { %362 = vmatmul.mubr.msk.f32.gmra.mrb[2].mxu0 %vm58_vm0, %v28_v15 }
  0x2b   :  { %437 = vmatpush3.bf16.msra.mxu1 %v434_v1 }
  0x2c   :  { %439 = vmatprep.subr.bf16.mxu1 %v438_v4 }
  0x2f   :  { %441 = vmatpush3.bf16.msra.mxu1 %v438_v4 }
  0x30   :  { %443 = vmatprep.subr.bf16.mxu1 %v442_v7 }
  0x33   :  { %445 = vmatpush3.bf16.msra.mxu1 %v442_v7 }
  0x34   :  { %447 = vmatprep.subr.bf16.mxu1 %v446_v10 }
  0x37   :  { %449 = vmatpush3.bf16.msra.mxu1 %v446_v10 }
  0xf8   :  { %v360_v19 = vpop.f32.mrb[0].mxu0 }
  0xf9   :  { %v137_v20 = vpop.f32.mrb[1].mxu0  ;;  %v544_v22 = vadd.f32 %v360_v19, %v305_v18 }
  0xfa   :  { %v542_v21 = vadd.f32 %v305_v18, %v137_v20 }
  0xfb   :  { %v160_v29 = vsel %vm158_vm1, %v544_v22, -inf }
  0xfc   :  { %v363_v23 = vpop.f32.mrb[2].mxu0  ;;  %v159_v24 = vsel %vm158_vm1, %v542_v21, -inf  ;;  %v203_v31 = vsel %vm158_vm1, 0.0, %v542_v21 }
  0xfd   :  { %v147_v25 = vpop.f32.mrb[3].mxu0  ;;  %163 = vmax.xlane.f32.xlu0 %v159_v24  ;;  %v551_v27 = vadd.f32 %v363_v23, %v305_v18 }
  0xfe   :  { %v549_v26 = vadd.f32 %v305_v18, %v147_v25 }
  0xff   :  { %v162_v30 = vsel %vm158_vm1, %v551_v27, -inf }
 0x100   :  { %v161_v28 = vsel %vm158_vm1, %v549_v26, -inf }
 0x101   :  { %167 = vmax.xlane.f32.xlu1 %v161_v28  ;;  %165 = vmax.xlane.f32.xlu0 %v160_v29  ;;  %v204_v28 = vsel %vm158_vm1, 0.0, %v544_v22 }
 0x105   :  { %169 = vmax.xlane.f32.xlu1 %v162_v30 }
 0x18a   :  { %v164_v43 = vpop.xlane.xlu0 %163 }
 0x18b   :  { %v171_v44 = vsub.f32 %v542_v21, %v164_v43  ;;  %v205_v21 = vsel %vm158_vm1, 0.0, %v549_v26 }
 0x18d   :  { %v175_v45 = vmul.f32 1.442695, %v171_v44 }
 0x18e   :  { %v168_v46 = vpop.xlane.xlu1 %167  ;;  %v166_v47 = vpop.xlane.xlu0 %165 }
 0x18f   :  { %453 = vpow2.f32 %v175_v45  ;;  %v173_v48 = vsub.f32 %v549_v26, %v168_v46  ;;  %v172_v49 = vsub.f32 %v544_v22, %v166_v47  ;;  %v206_v22 = vsel %vm158_vm1, 0.0, %v551_v27 }
 0x191   :  { %v179_v50 = vmul.f32 1.442695, %v173_v48  ;;  %v177_v51 = vmul.f32 1.442695, %v172_v49 }
 0x192   :  { %v170_v52 = vpop.xlane.xlu1 %169 }
 0x193   :  { %455 = vpow2.f32 %v179_v50  ;;  %v174_v53 = vsub.f32 %v551_v27, %v170_v52 }
 0x194   :  { %457 = vpow2.f32 %v177_v51 }
 0x195   :  { %v181_v54 = vmul.f32 1.442695, %v174_v53 }
 0x197   :  { %459 = vpow2.f32 %v181_v54 }
 0x199   :  { %v454_v55 = vpop.eup %453 }
 0x19a   :  { %v183_v56 = vsel %vm158_vm1, %v454_v55, 0.0 }
 0x19b   :  { %187 = vadd.xlane.f32.xlu0 %v183_v56 }
 0x19d   :  { %v456_v57 = vpop.eup %455 }
 0x19e   :  { %v458_v58 = vpop.eup %457  ;;  %v185_v59 = vsel %vm158_vm1, %v456_v57, 0.0 }
 0x19f   :  { %191 = vadd.xlane.f32.xlu0 %v185_v59  ;;  %v184_v60 = vsel %vm158_vm1, %v458_v58, 0.0 }
 0x1a0   :  { %189 = vadd.xlane.f32.xlu1 %v184_v60 }
 0x1a1   :  { %v460_v61 = vpop.eup %459 }
 0x1a2   :  { %v186_v62 = vsel %vm158_vm1, %v460_v61, 0.0 }
 0x1a4   :  { %193 = vadd.xlane.f32.xlu1 %v186_v62 }
 0x228   :  { %v188_v11 = vpop.xlane.xlu0 %187 }
 0x229   :  { %461 = vrcp.f32 %v188_v11 }
 0x22c   :  { %v192_v12 = vpop.xlane.xlu0 %191 }
 0x22d   :  { %v190_v13 = vpop.xlane.xlu1 %189  ;;  %463 = vrcp.f32 %v192_v12 }
 0x22e   :  { %465 = vrcp.f32 %v190_v13 }
 0x231   :  { %v194_v14 = vpop.xlane.xlu1 %193 }
 0x232   :  { %467 = vrcp.f32 %v194_v14 }
 0x233   :  { %v462_v15 = vpop.eup %461 }
 0x234   :  { %v199_v16 = vmul.f32 %v462_v15, %v183_v56 }
 0x236   :  { %396 = vmatprep.mubr.f32.mxu1 %v199_v16 }
 0x237   :  { %v464_v18 = vpop.eup %463 }
 0x238   :  { %v466_v19 = vpop.eup %465  ;;  %v201_v20 = vmul.f32 %v464_v18, %v185_v59 }
 0x239   :  { %v200_v23 = vmul.f32 %v466_v19, %v184_v60 }
 0x23b   :  { %397 = vmatmul.mubr.f32.vlgmr.msra.gmra.mrb[0].mxu1 %v200_v23 }
 0x23c   :  { %v468_v24 = vpop.eup %467  ;;  %399 = vmatprep.mubr.f32.mxu1 %v201_v20 }
 0x23d   :  { %v202_v25 = vmul.f32 %v468_v24, %v186_v62 }
 0x23f   :  { %400 = vmatmul.mubr.f32.gmra.mrb[2].mxu1 %v202_v25 }
 0x30e   :  { %v398_v29 = vpop.f32.mrb[0].mxu1 }
 0x30f   :  { %v293_v30 = vadd.f32 %v398_v29, %v204_v28  ;;  %v273_v32 = vpop.f32.mrb[1].mxu1 }
 0x310   :  { %v292_v33 = vadd.f32 %v273_v32, %v203_v31 }
 0x311   :  { %297 = vst [vmem:[%s600_s2 + $0x8] sm:$0xff] %v293_v30 }
 0x312   :  { %296 = vst [vmem:[%s600_s2] sm:$0xff] %v292_v33  ;;  %v401_v34 = vpop.f32.mrb[2].mxu1 }
 0x313   :  { %v295_v35 = vadd.f32 %v401_v34, %v206_v22  ;;  %v283_v36 = vpop.f32.mrb[3].mxu1 }
 0x314   :  { %v294_v37 = vadd.f32 %v283_v36, %v205_v21 }
 0x315   :  { %299 = vst [vmem:[%s600_s2 + $0x18] sm:$0xff] %v295_v35 }
 0x316   :  { %298 = vst [vmem:[%s600_s2 + $0x10] sm:$0xff] %v294_v37 }
 0x317   :  { %304 = vsyncpa [#allocation3], 1 }

</bundles_post_ra>
